<compile_context>
chip_gen: v5e
topology: v5e:2x2
jax: 0.10.0
libtpu: 0.0.40
codegen_flags: <defaults>
</compile_context>

<pallas_src>
import functools

import jax
import jax.numpy as jnp
from jax.experimental import pallas as pl
from jax.experimental.pallas import tpu as pltpu

_LANES = 128
_SUBLANES = 8
_ALIGN = _LANES * _SUBLANES          # 1024 elements
_MAX_TILE_ROWS = 8192                # (8192, 128) f32 block = 4 MiB per input
_ACC_ROWS = 64                       # 8 independent accumulation vreg chains


def _prepare(x):
    """Flatten `x`; return (lane-dense 2-D main view, rows, tail sum-of-squares)."""
    flat = jnp.ravel(x)
    n = flat.shape[0]
    n_main = (n // _ALIGN) * _ALIGN
    if n_main == 0:
        # Whole tensor (<1024 elems) is handled by the tail term; feed a zero block.
        x2d = jnp.zeros((_SUBLANES, _LANES), dtype=jnp.float32)
        rows = _SUBLANES
    else:
        # Zero-copy when n is 1024-aligned (the common case for feature-map grads).
        # TODO(synk): a fully zero-copy unaligned path would need a 1-D ANY-space
        # ref + manual DMA with an element-level lane mask on the last chunk.
        x2d = flat[:n_main].reshape(n_main // _LANES, _LANES)
        rows = n_main // _LANES
    tail = flat[n_main:].astype(jnp.float32)
    tail_ssq = jnp.sum(tail * tail)   # 0-sized -> 0.0 (constant-folded when aligned)
    return x2d, rows, tail_ssq


def _tiling(rows, max_tile_rows):
    max_tile_rows = max(_SUBLANES, (max_tile_rows // _SUBLANES) * _SUBLANES)
    tile_rows = min(rows, max_tile_rows)
    nblocks = pl.cdiv(rows, tile_rows)
    acc_rows = _ACC_ROWS if tile_rows % _ACC_ROWS == 0 else _SUBLANES
    return tile_rows, nblocks, acc_rows


def _index_map(nblocks, grid_blocks):
    if nblocks == grid_blocks:
        return lambda i: (i, 0)
    last = nblocks - 1
    # Clamp once this input's blocks are exhausted: the block index stops
    # changing, so the pipeline does not need to re-fetch new data.
    return lambda i: (jnp.minimum(i, last), 0)


def _make_accumulate(rows, tile_rows, nblocks, grid_blocks, acc_rows):
    last_rows = rows - (nblocks - 1) * tile_rows

    def add_block(x_ref, acc_ref, valid_rows):
        x = x_ref[...].astype(jnp.float32)
        if valid_rows != tile_rows:
            rid = jax.lax.broadcasted_iota(jnp.int32, x.shape, 0)
            x = jnp.where(rid < valid_rows, x, jnp.float32(0.0))
        sq = x * x
        # (tile_rows,128) -> (tile_rows//acc_rows, acc_rows, 128); summing the
        # leading axis gives acc_rows//8 independent vreg add chains (VPU only).
        acc_ref[...] += jnp.sum(
            sq.reshape(tile_rows // acc_rows, acc_rows, _LANES), axis=0)

    def accumulate(x_ref, acc_ref, i):
        if last_rows == tile_rows:
            if nblocks == grid_blocks:
                add_block(x_ref, acc_ref, tile_rows)      # unconditional hot path
            else:
                @pl.when(i < nblocks)
                def _():
                    add_block(x_ref, acc_ref, tile_rows)
        else:
            # Only the final (partial) block pays the mask; every other step is
            # the unmasked fast path.
            @pl.when(i < nblocks - 1)
            def _():
                add_block(x_ref, acc_ref, tile_rows)

            @pl.when(i == nblocks - 1)
            def _():
                add_block(x_ref, acc_ref, last_rows)

    return accumulate


@functools.partial(jax.jit, static_argnames=("temperature", "max_tile_rows"))
def feature_balance_loss(shared_features, personal_gradients, global_gradients,
                         temperature=1.0, max_tile_rows=_MAX_TILE_ROWS):
    """Pallas-backed FeatureBalanceLoss.forward. Returns a scalar f32.

    `shared_features` and `temperature` are unused in the forward math
    (matching the PyTorch reference) but kept for API parity.
    """
    del shared_features, temperature  # unused in the reference forward math

    p2d, rows_p, tail_p = _prepare(personal_gradients)
    g2d, rows_g, tail_g = _prepare(global_gradients)
    tails = jnp.stack([tail_p, tail_g])                    # (2,) f32, lives in SMEM

    tile_p, nblk_p, acc_rows_p = _tiling(rows_p, max_tile_rows)
    tile_g, nblk_g, acc_rows_g = _tiling(rows_g, max_tile_rows)
    grid_blocks = max(nblk_p, nblk_g)

    accumulate_p = _make_accumulate(rows_p, tile_p, nblk_p, grid_blocks, acc_rows_p)
    accumulate_g = _make_accumulate(rows_g, tile_g, nblk_g, grid_blocks, acc_rows_g)

    def kernel(tails_ref, p_ref, g_ref, out_ref, acc_p_ref, acc_g_ref):
        i = pl.program_id(0)

        @pl.when(i == 0)
        def _():
            acc_p_ref[...] = jnp.zeros_like(acc_p_ref)
            acc_g_ref[...] = jnp.zeros_like(acc_g_ref)

        accumulate_p(p_ref, acc_p_ref, i)
        accumulate_g(g_ref, acc_g_ref, i)

        @pl.when(i == grid_blocks - 1)
        def _():
            ssq_p = jnp.sum(jnp.sum(acc_p_ref[...], axis=0, keepdims=True),
                            axis=1, keepdims=True) + tails_ref[0]
            ssq_g = jnp.sum(jnp.sum(acc_g_ref[...], axis=0, keepdims=True),
                            axis=1, keepdims=True) + tails_ref[1]
            norm_p = jnp.sqrt(ssq_p)
            norm_g = jnp.sqrt(ssq_g)
            total = norm_p + norm_g + jnp.float32(1e-8)
            out_ref[...] = (jnp.abs(norm_p / total - 0.5)
                            + jnp.abs(norm_g / total - 0.5))

    # Scoped-VMEM budget: double-buffered inputs (f32 upper bound) plus
    # elementwise intermediates, clamped to stay below every chip's physical VMEM.
    block_bytes = (tile_p + tile_g) * _LANES * 4
    vmem_limit = int(min(max(5 * block_bytes + (2 << 20), 16 << 20), 56 << 20))

    in_bytes = (p2d.size * p2d.dtype.itemsize + g2d.size * g2d.dtype.itemsize)

    out = pl.pallas_call(
        kernel,
        out_shape=jax.ShapeDtypeStruct((1, 1), jnp.float32),
        grid_spec=pltpu.PrefetchScalarGridSpec(
            num_scalar_prefetch=0,
            grid=(grid_blocks,),
            in_specs=[
                pl.BlockSpec(memory_space=pltpu.MemorySpace.SMEM),   # tail ssq pair
                pl.BlockSpec((tile_p, _LANES), _index_map(nblk_p, grid_blocks)),
                pl.BlockSpec((tile_g, _LANES), _index_map(nblk_g, grid_blocks)),
            ],
            out_specs=pl.BlockSpec((1, 1), lambda i: (0, 0)),
            scratch_shapes=[
                pltpu.VMEM((acc_rows_p, _LANES), jnp.float32),
                pltpu.VMEM((acc_rows_g, _LANES), jnp.float32),
            ],
        ),
        compiler_params=pltpu.CompilerParams(
            # Carried accumulators + resident scalar output => sequential grid.
            dimension_semantics=("arbitrary",),
            vmem_limit_bytes=vmem_limit,
        ),
        cost_estimate=pl.CostEstimate(
            flops=2 * (p2d.size + g2d.size),
            transcendentals=2,
            bytes_accessed=in_bytes + tails.size * 4 + 4,
        ),
    )(tails, p2d, g2d)
    return out[0, 0]


def _reference(personal_gradients, global_gradients):
    """Plain-JAX reference mirroring the PyTorch forward."""
    p = jnp.linalg.norm(jnp.ravel(personal_gradients).astype(jnp.float32))
    g = jnp.linalg.norm(jnp.ravel(global_gradients).astype(jnp.float32))
    total = p + g + 1e-8
    return jnp.abs(p / total - 0.5) + jnp.abs(g / total - 0.5)


if __name__ == "__main__":
    key = jax.random.PRNGKey(0)
    k1, k2, k3, k4, k5, k6 = jax.random.split(key, 6)

    # Primary small case: NCHW gradients of shared conv features.
    shared_features = jax.random.normal(k1, (2, 4, 16, 16), dtype=jnp.float32)
    personal_gradients = jax.random.normal(k2, (2, 4, 16, 16), dtype=jnp.float32) * 0.7
    global_gradients = jax.random.normal(k3, (2, 4, 16, 16), dtype=jnp.float32) * 1.3

    loss = jax.block_until_ready(
        feature_balance_loss(shared_features, personal_gradients, global_gradients))
    ref = _reference(personal_gradients, global_gradients)
    assert jnp.allclose(loss, ref, rtol=1e-5, atol=1e-6), (loss, ref)

    # Multi-block + masked tail block + mismatched sizes (small max_tile_rows
    # exercises the multi-block / clamped-index-map paths with tiny tensors).
    p2 = jax.random.normal(k4, (40, 128), dtype=jnp.float32)   # 3 blocks of 16 rows, last masked
    g2 = jax.random.normal(k5, (16, 128), dtype=jnp.float32)   # 1 block, clamped index map
    loss2 = jax.block_until_ready(
        feature_balance_loss(shared_features, p2, g2, max_tile_rows=16))
    ref2 = _reference(p2, g2)
    assert jnp.allclose(loss2, ref2, rtol=1e-5, atol=1e-6), (loss2, ref2)

    # Unaligned element counts: aligned prefix through the kernel + SMEM tail term.
    p3 = jax.random.normal(k6, (1030,), dtype=jnp.float32)     # 1024 prefix + 6 tail
    g3 = jax.random.normal(k1, (100,), dtype=jnp.float32)      # all-tail (< 1024)
    loss3 = jax.block_until_ready(feature_balance_loss(shared_features, p3, g3))
    ref3 = _reference(p3, g3)
    assert jnp.allclose(loss3, ref3, rtol=1e-5, atol=1e-6), (loss3, ref3)

    # TODO(synk): PyTorch's `gradients is None` -> importance 0 path is handled
    # by the caller (pass a zero/empty array).
    print("KERNEL_OK")
</pallas_src>

<mosaic_0001>
module attributes {stable_mosaic.version = 11 : i64} {
  func.func @kernel(%arg0: i32, %arg1: memref<2xf32, #tpu.memory_space<smem>>, %arg2: memref<16x128xf32, #tpu.memory_space<vmem>>, %arg3: memref<16x128xf32, #tpu.memory_space<vmem>>, %arg4: memref<1x1xf32, #tpu.memory_space<vmem>>, %arg5: memref<8x128xf32, #tpu.memory_space<vmem>>, %arg6: memref<8x128xf32, #tpu.memory_space<vmem>>) attributes {dimension_semantics = [#tpu.dimension_semantics<arbitrary>], iteration_bounds = array<i64: 1>, scalar_prefetch = 0 : i64, scratch_operands = 2 : i64, tpu.core_type = #tpu.core_type<tc>, window_params = [{transform_indices = @transform_0, window_bounds = array<i64: 2>}, {transform_indices = @transform_1, window_bounds = array<i64: 16, 128>}, {transform_indices = @transform_2, window_bounds = array<i64: 16, 128>}, {pipeline_mode = #tpu.pipeline_mode<synchronous>, transform_indices = @transform_3, window_bounds = array<i64: 1, 1>}]} {
    %c0_i32 = arith.constant 0 : i32
    %0 = arith.cmpi eq, %arg0, %c0_i32 : i32
    %1 = arith.extui %0 : i1 to i32
    %c0_i32_0 = arith.constant 0 : i32
    %2 = arith.cmpi ne, %1, %c0_i32_0 : i32
    scf.if %2 {
      %cst_15 = arith.constant 0.000000e+00 : f32
      %20 = vector.broadcast %cst_15 : f32 to vector<8x128xf32>
      %c0_16 = arith.constant 0 : index
      %c0_17 = arith.constant 0 : index
      %21 = vector.load %arg5[%c0_16, %c0_17] : memref<8x128xf32, #tpu.memory_space<vmem>>, vector<8x128xf32>
      tpu.vector_store %arg5[%c0_16, %c0_17], %20 {strides = array<i32>} : memref<8x128xf32, #tpu.memory_space<vmem>>, vector<8x128xf32>,
      %cst_18 = arith.constant 0.000000e+00 : f32
      %22 = vector.broadcast %cst_18 : f32 to vector<8x128xf32>
      %c0_19 = arith.constant 0 : index
      %c0_20 = arith.constant 0 : index
      %23 = vector.load %arg6[%c0_19, %c0_20] : memref<8x128xf32, #tpu.memory_space<vmem>>, vector<8x128xf32>
      tpu.vector_store %arg6[%c0_19, %c0_20], %22 {strides = array<i32>} : memref<8x128xf32, #tpu.memory_space<vmem>>, vector<8x128xf32>,
    } else {
    }
    %c0 = arith.constant 0 : index
    %c0_1 = arith.constant 0 : index
    %3 = vector.load %arg2[%c0, %c0_1] : memref<16x128xf32, #tpu.memory_space<vmem>>, vector<16x128xf32>
    %4 = arith.mulf %3, %3 : vector<16x128xf32>
    %c0_2 = arith.constant 0 : index
    %c0_3 = arith.constant 0 : index
    %5 = vector.load %arg5[%c0_2, %c0_3] : memref<8x128xf32, #tpu.memory_space<vmem>>, vector<8x128xf32>
    %6 = vector.shape_cast %4 : vector<16x128xf32> to vector<2x8x128xf32>
    %cst = arith.constant dense<0.000000e+00> : vector<8x128xf32>
    %7 = vector.multi_reduction <add>, %6, %cst [0] : vector<2x8x128xf32> to vector<8x128xf32>
    %8 = arith.addf %5, %7 : vector<8x128xf32>
    %c0_4 = arith.constant 0 : index
    %c0_5 = arith.constant 0 : index
    %9 = vector.load %arg5[%c0_4, %c0_5] : memref<8x128xf32, #tpu.memory_space<vmem>>, vector<8x128xf32>
    tpu.vector_store %arg5[%c0_4, %c0_5], %8 {strides = array<i32>} : memref<8x128xf32, #tpu.memory_space<vmem>>, vector<8x128xf32>,
    %c0_6 = arith.constant 0 : index
    %c0_7 = arith.constant 0 : index
    %10 = vector.load %arg3[%c0_6, %c0_7] : memref<16x128xf32, #tpu.memory_space<vmem>>, vector<16x128xf32>
    %11 = arith.mulf %10, %10 : vector<16x128xf32>
    %c0_8 = arith.constant 0 : index
    %c0_9 = arith.constant 0 : index
    %12 = vector.load %arg6[%c0_8, %c0_9] : memref<8x128xf32, #tpu.memory_space<vmem>>, vector<8x128xf32>
    %13 = vector.shape_cast %11 : vector<16x128xf32> to vector<2x8x128xf32>
    %cst_10 = arith.constant dense<0.000000e+00> : vector<8x128xf32>
    %14 = vector.multi_reduction <add>, %13, %cst_10 [0] : vector<2x8x128xf32> to vector<8x128xf32>
    %15 = arith.addf %12, %14 : vector<8x128xf32>
    %c0_11 = arith.constant 0 : index
    %c0_12 = arith.constant 0 : index
    %16 = vector.load %arg6[%c0_11, %c0_12] : memref<8x128xf32, #tpu.memory_space<vmem>>, vector<8x128xf32>
    tpu.vector_store %arg6[%c0_11, %c0_12], %15 {strides = array<i32>} : memref<8x128xf32, #tpu.memory_space<vmem>>, vector<8x128xf32>,
    %c0_i32_13 = arith.constant 0 : i32
    %17 = arith.cmpi eq, %arg0, %c0_i32_13 : i32
    %18 = arith.extui %17 : i1 to i32
    %c0_i32_14 = arith.constant 0 : i32
    %19 = arith.cmpi ne, %18, %c0_i32_14 : i32
    scf.if %19 {
      %c0_15 = arith.constant 0 : index
      %c0_16 = arith.constant 0 : index
      %20 = vector.load %arg5[%c0_15, %c0_16] : memref<8x128xf32, #tpu.memory_space<vmem>>, vector<8x128xf32>
      %cst_17 = arith.constant dense<0.000000e+00> : vector<128xf32>
      %21 = vector.multi_reduction <add>, %20, %cst_17 [0] : vector<8x128xf32> to vector<128xf32>
      %22 = vector.shape_cast %21 : vector<128xf32> to vector<1x128xf32>
      %cst_18 = arith.constant dense<0.000000e+00> : vector<1xf32>
      %23 = vector.multi_reduction <add>, %22, %cst_18 [1] : vector<1x128xf32> to vector<1xf32>
      %24 = vector.shape_cast %23 : vector<1xf32> to vector<1x1xf32>
      %c0_19 = arith.constant 0 : index
      %25 = memref.load %arg1[%c0_19] : memref<2xf32, #tpu.memory_space<smem>>
      %26 = vector.broadcast %25 : f32 to vector<1x1xf32>
      %27 = arith.addf %24, %26 : vector<1x1xf32>
      %c0_20 = arith.constant 0 : index
      %c0_21 = arith.constant 0 : index
      %28 = vector.load %arg6[%c0_20, %c0_21] : memref<8x128xf32, #tpu.memory_space<vmem>>, vector<8x128xf32>
      %cst_22 = arith.constant dense<0.000000e+00> : vector<128xf32>
      %29 = vector.multi_reduction <add>, %28, %cst_22 [0] : vector<8x128xf32> to vector<128xf32>
      %30 = vector.shape_cast %29 : vector<128xf32> to vector<1x128xf32>
      %cst_23 = arith.constant dense<0.000000e+00> : vector<1xf32>
      %31 = vector.multi_reduction <add>, %30, %cst_23 [1] : vector<1x128xf32> to vector<1xf32>
      %32 = vector.shape_cast %31 : vector<1xf32> to vector<1x1xf32>
      %c1 = arith.constant 1 : index
      %33 = memref.load %arg1[%c1] : memref<2xf32, #tpu.memory_space<smem>>
      %34 = vector.broadcast %33 : f32 to vector<1x1xf32>
      %35 = arith.addf %32, %34 : vector<1x1xf32>
      %36 = math.sqrt %27 : vector<1x1xf32>
      %37 = math.sqrt %35 : vector<1x1xf32>
      %38 = arith.addf %36, %37 : vector<1x1xf32>
      %cst_24 = arith.constant 9.99999993E-9 : f32
      %39 = vector.broadcast %cst_24 : f32 to vector<1x1xf32>
      %40 = arith.addf %38, %39 : vector<1x1xf32>
      %41 = arith.divf %36, %40 : vector<1x1xf32>
      %cst_25 = arith.constant 5.000000e-01 : f32
      %42 = vector.broadcast %cst_25 : f32 to vector<1x1xf32>
      %43 = arith.subf %41, %42 : vector<1x1xf32>
      %44 = math.absf %43 : vector<1x1xf32>
      %45 = arith.divf %37, %40 : vector<1x1xf32>
      %cst_26 = arith.constant 5.000000e-01 : f32
      %46 = vector.broadcast %cst_26 : f32 to vector<1x1xf32>
      %47 = arith.subf %45, %46 : vector<1x1xf32>
      %48 = math.absf %47 : vector<1x1xf32>
      %49 = arith.addf %44, %48 : vector<1x1xf32>
      %c0_27 = arith.constant 0 : index
      %c0_28 = arith.constant 0 : index
      %50 = vector.load %arg4[%c0_27, %c0_28] : memref<1x1xf32, #tpu.memory_space<vmem>>, vector<1x1xf32>
      tpu.vector_store %arg4[%c0_27, %c0_28], %49 {strides = array<i32>} : memref<1x1xf32, #tpu.memory_space<vmem>>, vector<1x1xf32>,
    } else {
    }
    return
  }
  func.func @transform_0(%arg0: i32) -> i32 {
    %c0_i32 = arith.constant 0 : i32
    %c0_i32_0 = arith.constant 0 : i32
    return %c0_i32 : i32
  }
  func.func @transform_1(%arg0: i32) -> (i32, i32) {
    %c0_i32 = arith.constant 0 : i32
    %c0_i32_0 = arith.constant 0 : i32
    return %arg0, %c0_i32 : i32, i32
  }
  func.func @transform_2(%arg0: i32) -> (i32, i32) {
    %c0_i32 = arith.constant 0 : i32
    %c0_i32_0 = arith.constant 0 : i32
    return %arg0, %c0_i32 : i32, i32
  }
  func.func @transform_3(%arg0: i32) -> (i32, i32) {
    %c0_i32 = arith.constant 0 : i32
    %c0_i32_0 = arith.constant 0 : i32
    %c0_i32_1 = arith.constant 0 : i32
    return %c0_i32, %c0_i32_0 : i32, i32
  }
}

</mosaic_0001>

<bundles_post_ra>
// kernel: feature_balance_loss.1
= control target key start
LH: loop header
LB: loop body
LE: loop exit
PB: predicated region body
PF: predicated region fallthrough
CT: control target
= control target key end

     0   :  { %8 = vsyncpa [#allocation6], 0  ;;  %s234_s0 = inlined_call_operand.vmem [shape: f32[2], index: 0, kind: input, shape index: {}]   ;;  %s235_s1 = inlined_call_operand.vmem [shape: f32[16,128], index: 1, kind: input, shape index: {}]   ;;  %s236_s2 = inlined_call_operand.vmem [shape: f32[16,128], index: 2, kind: input, shape index: {}]   ;;  %s237_s3 = inlined_call_operand.hbm [shape: f32[1,1], index: 3, kind: output, shape index: {}]  }
   0x1   :  { %9 = vsyncpa [#allocation5], 0  ;;  %s15_s14 = sshll.u32 %s234_s0, 4  ;;  %s194_s15 = smov [#allocation4]   ;;  %s16_s14 = int_to_ptr.vmem [resolvable:$true] %s15_s14 }
   0x2   :  { %18 = dma.vmem_to_smem %s16_s14, 16, %s194_s15, [#allocation6]  }
   0x3   :  { %190 = dma.done.wait [#allocation6], 16  }
   0x4   :  { %191 = vsyncadd [#allocation6], 4294967280 }
   0x5   :  { %27 = sfence }
   0x6   :  { %v34_v0 = vld [vmem:[%s235_s1] sm:$0xff]  ;;  %v35_v1 = vld [vmem:[%s235_s1 + $0x8] sm:$0xff]  ;;  %s62_s1 = sld [smem:[#allocation4]]  ;;  %s195_s23 = smov [#allocation7]   ;;  %vm124_vm8 = vcmask 0  }
   0x7   :  { %v42_v2 = vld [vmem:[%s236_s2] sm:$0xff]  ;;  %v36_v3 = vmul.f32 %v34_v0, %v34_v0  ;;  %v37_v4 = vmul.f32 %v35_v1, %v35_v1  ;;  %v43_v5 = vld [vmem:[%s236_s2 + $0x8] sm:$0xff]  ;;  %s143_s2 = sld [smem:[#allocation4 + $0x1]]  ;;  %s131_s24 = sshll.u32 %s195_s23, 4  ;;  %s132_s24 = int_to_ptr.vmem [resolvable:$true] %s131_s24 }
   0x8   :  { %v44_v6 = vmul.f32 %v42_v2, %v42_v2  ;;  %v45_v7 = vmul.f32 %v43_v5, %v43_v5  ;;  %s133_s27 = sshll.u32 %s237_s3, 4  ;;  %s134_s27 = int_to_ptr.hbm [resolvable:$true] %s133_s27 }
   0x9   :  { %v39_v8 = vadd.f32 %v37_v4, %v36_v3 }
   0xa   :  { %v47_v9 = vadd.f32 %v45_v7, %v44_v6 }
   0xb   :  { %v54_v10 = vrot.slane %v39_v8, 4 }
   0xc   :  { %v66_v11 = vrot.slane %v47_v9, 4  ;;  %v63_v22 = vstv %s62_s1 }
   0xd   :  { %v55_v12 = vadd.f32 %v54_v10, %v39_v8  ;;  %v75_v25 = vstv %s143_s2 }
   0xe   :  { %v67_v13 = vadd.f32 %v66_v11, %v47_v9 }
   0xf   :  { %v56_v14 = vrot.slane %v55_v12, 2 }
  0x10   :  { %v68_v15 = vrot.slane %v67_v13, 2 }
  0x11   :  { %v57_v16 = vadd.f32 %v56_v14, %v55_v12 }
  0x12   :  { %v69_v18 = vadd.f32 %v68_v15, %v67_v13 }
  0x13   :  { %v58_v17 = vrot.slane %v57_v16, 1 }
  0x14   :  { %v70_v20 = vrot.slane %v69_v18, 1 }
  0x15   :  { %v59_v19 = vadd.f32 %v58_v17, %v57_v16 }
  0x16   :  { %v71_v21 = vadd.f32 %v70_v20, %v69_v18 }
  0x17   :  { %60 = vadd.xlane.f32.xlu0 %v59_v19 }
  0x1f   :  { %72 = vadd.xlane.f32.xlu0 %v71_v21 }
  0x8a   :  { %v61_v23 = vpop.xlane.xlu0 %60 }
  0x8b   :  { %v64_v24 = vadd.f32 %v63_v22, %v61_v23 }
  0x8d   :  { %148 = vrsqrt.f32 %v64_v24  ;;  %vm84_vm0 = vcmp.eq.f32.partialorder %v64_v24, inf  ;;  %v87_v43 = vand.u32 2147483648, %v64_v24  ;;  %vm86_vm2 = vcmp.eq.f32.partialorder %v64_v24, 0.0 }
  0x92   :  { %v73_v26 = vpop.xlane.xlu0 %72 }
  0x93   :  { %v149_v27 = vpop.eup %148  ;;  %v76_v28 = vadd.f32 %v75_v25, %v73_v26 }
  0x94   :  { %v78_v29 = vmul.f32 %v149_v27, %v64_v24 }
  0x95   :  { %150 = vrsqrt.f32 %v76_v28  ;;  %vm96_vm1 = vcmp.eq.f32.partialorder %v76_v28, inf  ;;  %v99_v44 = vand.u32 2147483648, %v76_v28  ;;  %vm98_vm3 = vcmp.eq.f32.partialorder %v76_v28, 0.0 }
  0x96   :  { %v79_v30 = vmul.f32 %v149_v27, %v78_v29 }
  0x98   :  { %v80_v31 = vmul.f32 0.5, %v79_v30 }
  0x9a   :  { %v81_v32 = vsub.f32 1.5, %v80_v31 }
  0x9b   :  { %v151_v33 = vpop.eup %150 }
  0x9c   :  { %v90_v34 = vmul.f32 %v151_v33, %v76_v28  ;;  %v82_v35 = vmul.f32 %v149_v27, %v81_v32 }
  0x9e   :  { %v91_v36 = vmul.f32 %v151_v33, %v90_v34  ;;  %v83_v38 = vmul.f32 %v82_v35, %v64_v24 }
  0xa0   :  { %v92_v37 = vmul.f32 0.5, %v91_v36  ;;  %v85_v41 = vsel %vm84_vm0, %v64_v24, %v83_v38 }
  0xa1   :  { %v88_v46 = vsel %vm86_vm2, %v87_v43, %v85_v41 }
  0xa2   :  { %v93_v39 = vsub.f32 1.5, %v92_v37 }
  0xa4   :  { %v94_v40 = vmul.f32 %v151_v33, %v93_v39 }
  0xa6   :  { %v95_v42 = vmul.f32 %v94_v40, %v76_v28 }
  0xa8   :  { %v97_v45 = vsel %vm96_vm1, %v76_v28, %v95_v42 }
  0xa9   :  { %v100_v47 = vsel %vm98_vm3, %v99_v44, %v97_v45 }
  0xaa   :  { %v101_v48 = vadd.f32 %v100_v47, %v88_v46 }
  0xac   :  { %v102_v49 = vadd.f32 1e-08, %v101_v48 }
  0xae   :  { %152 = vrcp.f32 %v102_v49  ;;  %v114_v53 = vand.u32 2147483648, %v102_v49  ;;  %v112_v55 = vand.u32 2147483647, %v102_v49  ;;  %vm108_vm5 = vweird.f32 %v102_v49 }
  0xb0   :  { %v115_v57 = vor.u32 1.1754944e-38, %v114_v53  ;;  %vm113_vm7 = vcmp.eq.f32.partialorder %v112_v55, 8.507059e+37 }
  0xb4   :  { %v153_v50 = vpop.eup %152 }
  0xb5   :  { %v104_v51 = vmul.f32 %v153_v50, %v102_v49  ;;  %vm109_vm4 = vweird.f32 %v153_v50 }
  0xb6   :  { %vm110_vm6 = vmor %vm108_vm5, %vm109_vm4 }
  0xb7   :  { %v105_v52 = vsub.f32 1.0, %v104_v51 }
  0xb9   :  { %v106_v54 = vmul.f32 %v153_v50, %v105_v52 }
  0xbb   :  { %v107_v56 = vadd.f32 %v153_v50, %v106_v54 }
  0xbd   :  { %v111_v58 = vsel %vm110_vm6, %v153_v50, %v107_v56 }
  0xbe   :  { %v116_v59 = vsel %vm113_vm7, %v115_v57, %v111_v58 }
  0xbf   :  { %v117_v60 = vmul.f32 %v116_v59, %v88_v46  ;;  %v120_v61 = vmul.f32 %v116_v59, %v100_v47 }
  0xc1   :  { %v144_v62 = vadd.f32 -0.5, %v117_v60  ;;  %v145_v63 = vadd.f32 -0.5, %v120_v61 }
  0xc3   :  { %v119_v0 = vand.u32 2147483647, %v144_v62  ;;  %v122_v1 = vand.u32 2147483647, %v145_v63 }
  0xc5   :  { %v123_v2 = vadd.f32 %v122_v1, %v119_v0 }
  0xc7   :  { %125 = vst.msk [vmem:[#allocation7] sm:$0x1] %vm124_vm8, %v123_v2 }
  0xc8   :  { %136 = dma.vmem_to_hbm [thread:$0]  %s132_s24, 16, %s134_s27, [#allocation5]  }
  0xc9   :  { %192 = dma.done.wait [#allocation5], 16  }
  0xca   :  { %193 = vsyncadd [#allocation5], 4294967280 }
  0xcb   :  { %141 = vsyncpa [#allocation5], 1 }
  0xcc   :  { %142 = vsyncpa [#allocation6], 1 }

</bundles_post_ra>
